<compile_context>
chip_gen: v5e
topology: v5e:2x2
jax: 0.10.0
libtpu: 0.0.40
codegen_flags: <defaults>
</compile_context>

<pallas_src>
import jax
import jax.numpy as jnp
from jax import lax
from jax.experimental import pallas as pl
from jax.experimental.pallas import tpu as pltpu


def _gated_control_kernel(x_ref, y_ref, w1_ref, w2_ref, o_ref):
    # x/y/o: [TM, D] token tiles; w1/w2: resident [D, D] blocks (PyTorch layout:
    # [out_features, in_features]), contracted on their last dim => x @ W^T.
    x = x_ref[...]
    y = y_ref[...]

    dn = (((1,), (1,)), ((), ()))  # contract activation dim 1 with weight dim 1
    logits = lax.dot_general(x, w1_ref[...], dn, preferred_element_type=jnp.float32)
    logits = logits + lax.dot_general(y, w2_ref[...], dn,
                                      preferred_element_type=jnp.float32)

    # Fused blend in f32:  o = y + sigmoid(logits) * (x - y)
    xf = x.astype(jnp.float32)
    yf = y.astype(jnp.float32)
    o_ref[...] = (yf + jax.nn.sigmoid(logits) * (xf - yf)).astype(o_ref.dtype)


def _round_up(a, b):
    return ((a + b - 1) // b) * b


def gated_control(x, y, w1, w2):
    """x, y: [B, S, D]; w1, w2: [D, D] in PyTorch nn.Linear convention (out = x @ W^T)."""
    B, S, D = x.shape
    ntok = B * S
    dtype = x.dtype
    itemsize = jnp.dtype(dtype).itemsize

    x2 = x.reshape(ntok, D)
    y2 = y.reshape(ntok, D)

    # ---- generation-aware VMEM budget (~75% of physical per-core VMEM) ------
    try:
        vmem_cap = int(pltpu.get_tpu_info().vmem_capacity_bytes)
    except Exception:
        vmem_cap = 64 * 1024 * 1024  # conservative (v7x-sized) fallback
    budget = int(0.75 * vmem_cap)

    row_align = 8 if itemsize >= 4 else (16 if itemsize == 2 else 32)
    lane_d = max(128, _round_up(D, 128))     # lane-padded width (VMEM accounting only)
    sub_d = _round_up(D, row_align)

    # Consistent VMEM model:
    #   weights : 2 blocks, single-buffered (Buffered(1)), lane/sublane padded
    #   tiles   : x, y, o double-buffered by the pipeline
    #   temps   : ~4 live f32 [TM, lane_d] intermediates inside the kernel
    weight_vmem = 2 * sub_d * lane_d * itemsize
    per_row = 3 * 2 * lane_d * itemsize + 4 * lane_d * 4

    avail = budget - weight_vmem
    tm = max(avail // per_row, row_align)
    tm = min(tm, 1024)                                       # ~86% HBM roofline already
    tm = min(tm, _round_up(pl.cdiv(ntok, 8), row_align))     # keep >=8 grid steps
    tm = max((tm // row_align) * row_align, row_align)

    grid = (pl.cdiv(ntok, tm),)  # ragged final block handled by Pallas

    needed = weight_vmem + tm * per_row + (2 << 20)
    vmem_limit = int(min(max(budget, needed), int(0.92 * vmem_cap)))

    cost = pl.CostEstimate(
        flops=4 * ntok * D * D,                        # two [tm,D]x[D,D] matmuls
        transcendentals=ntok * D,                      # sigmoid
        bytes_accessed=(3 * ntok * D + 2 * D * D) * itemsize,
    )

    def make_call(single_buffer_weights):
        if single_buffer_weights:
            w_specs = [
                pl.BlockSpec((D, D), lambda i: (0, 0), pipeline_mode=pl.Buffered(1)),
                pl.BlockSpec((D, D), lambda i: (0, 0), pipeline_mode=pl.Buffered(1)),
            ]
        else:
            w_specs = [
                pl.BlockSpec((D, D), lambda i: (0, 0)),
                pl.BlockSpec((D, D), lambda i: (0, 0)),
            ]
        return pl.pallas_call(
            _gated_control_kernel,
            out_shape=jax.ShapeDtypeStruct((ntok, D), dtype),
            grid_spec=pltpu.PrefetchScalarGridSpec(
                num_scalar_prefetch=0,
                grid=grid,
                in_specs=[
                    pl.BlockSpec((tm, D), lambda i: (i, 0)),  # x tokens (pipelined)
                    pl.BlockSpec((tm, D), lambda i: (i, 0)),  # y tokens (pipelined)
                ] + w_specs,                                   # W1, W2 (resident)
                out_specs=pl.BlockSpec((tm, D), lambda i: (i, 0)),
            ),
            compiler_params=pltpu.CompilerParams(
                dimension_semantics=("parallel",),
                vmem_limit_bytes=vmem_limit,
            ),
            cost_estimate=cost,
        )

    try:
        out2 = make_call(True)(x2, y2, w1, w2)
    except Exception:
        # Fallback if this jax build rejects pipeline_mode on pallas_call specs.
        out2 = make_call(False)(x2, y2, w1, w2)

    return out2.reshape(B, S, D)


if __name__ == "__main__":
    # Small config consistent with the module: batch=2, seq=8, d_model=32.
    B, S, D = 2, 8, 32
    key = jax.random.PRNGKey(0)
    kx, ky, kw1, kw2 = jax.random.split(key, 4)

    x = jax.random.normal(kx, (B, S, D), dtype=jnp.float32)
    y = jax.random.normal(ky, (B, S, D), dtype=jnp.float32)
    # nn.Linear(d_model, d_model, bias=False) weights: [out_features, in_features].
    w1 = jax.random.normal(kw1, (D, D), dtype=jnp.float32) * (1.0 / jnp.sqrt(D))
    w2 = jax.random.normal(kw2, (D, D), dtype=jnp.float32) * (1.0 / jnp.sqrt(D))

    out = gated_control(x, y, w1, w2)
    jax.block_until_ready(out)

    # Reference (eval-mode dropout = identity).
    gate_ref = jax.nn.sigmoid(x @ w1.T + y @ w2.T)
    ref = gate_ref * x + (1.0 - gate_ref) * y
    assert out.shape == ref.shape
    assert jnp.allclose(out, ref, atol=1e-4, rtol=1e-4), "mismatch vs reference"

    print("KERNEL_OK")
</pallas_src>

<mosaic_0001>
module attributes {stable_mosaic.version = 11 : i64} {
  func.func @_gated_control_kernel(%arg0: i32, %arg1: memref<8x32xf32, #tpu.memory_space<vmem>>, %arg2: memref<8x32xf32, #tpu.memory_space<vmem>>, %arg3: memref<32x32xf32, #tpu.memory_space<vmem>>, %arg4: memref<32x32xf32, #tpu.memory_space<vmem>>, %arg5: memref<8x32xf32, #tpu.memory_space<vmem>>) attributes {dimension_semantics = [#tpu.dimension_semantics<parallel>], iteration_bounds = array<i64: 2>, scalar_prefetch = 0 : i64, scratch_operands = 0 : i64, tpu.core_type = #tpu.core_type<tc>, window_params = [{transform_indices = @transform_0, window_bounds = array<i64: 8, 32>}, {transform_indices = @transform_1, window_bounds = array<i64: 8, 32>}, {pipeline_mode = #tpu.pipeline_mode<synchronous>, transform_indices = @transform_2, window_bounds = array<i64: 32, 32>}, {pipeline_mode = #tpu.pipeline_mode<synchronous>, transform_indices = @transform_3, window_bounds = array<i64: 32, 32>}, {transform_indices = @transform_4, window_bounds = array<i64: 8, 32>}]} {
    %c0 = arith.constant 0 : index
    %c0_0 = arith.constant 0 : index
    %0 = vector.load %arg1[%c0, %c0_0] : memref<8x32xf32, #tpu.memory_space<vmem>>, vector<8x32xf32>
    %c0_1 = arith.constant 0 : index
    %c0_2 = arith.constant 0 : index
    %1 = vector.load %arg2[%c0_1, %c0_2] : memref<8x32xf32, #tpu.memory_space<vmem>>, vector<8x32xf32>
    %c0_3 = arith.constant 0 : index
    %c0_4 = arith.constant 0 : index
    %2 = vector.load %arg3[%c0_3, %c0_4] : memref<32x32xf32, #tpu.memory_space<vmem>>, vector<32x32xf32>
    %cst = arith.constant dense<0.000000e+00> : vector<8x32xf32>
    %3 = tpu.matmul %0, %2, %cst {dimension_numbers = #tpu.dot_dimension_numbers<[1], [1], [0], [0], [0, 0, 1, 0], [], []>} : vector<8x32xf32>, vector<32x32xf32>, vector<8x32xf32> -> vector<8x32xf32>
    %c0_5 = arith.constant 0 : index
    %c0_6 = arith.constant 0 : index
    %4 = vector.load %arg4[%c0_5, %c0_6] : memref<32x32xf32, #tpu.memory_space<vmem>>, vector<32x32xf32>
    %cst_7 = arith.constant dense<0.000000e+00> : vector<8x32xf32>
    %5 = tpu.matmul %1, %4, %cst_7 {dimension_numbers = #tpu.dot_dimension_numbers<[1], [1], [0], [0], [0, 0, 1, 0], [], []>} : vector<8x32xf32>, vector<32x32xf32>, vector<8x32xf32> -> vector<8x32xf32>
    %6 = arith.addf %3, %5 : vector<8x32xf32>
    %7 = arith.negf %6 : vector<8x32xf32>
    %8 = math.exp %7 : vector<8x32xf32>
    %cst_8 = arith.constant 1.000000e+00 : f32
    %9 = vector.broadcast %cst_8 : f32 to vector<8x32xf32>
    %10 = arith.addf %9, %8 : vector<8x32xf32>
    %11 = arith.divf %9, %10 : vector<8x32xf32>
    %12 = arith.subf %0, %1 : vector<8x32xf32>
    %13 = arith.mulf %11, %12 : vector<8x32xf32>
    %14 = arith.addf %1, %13 : vector<8x32xf32>
    %c0_9 = arith.constant 0 : index
    %c0_10 = arith.constant 0 : index
    %15 = vector.load %arg5[%c0_9, %c0_10] : memref<8x32xf32, #tpu.memory_space<vmem>>, vector<8x32xf32>
    tpu.vector_store %arg5[%c0_9, %c0_10], %14 {strides = array<i32>} : memref<8x32xf32, #tpu.memory_space<vmem>>, vector<8x32xf32>,
    return
  }
  func.func @transform_0(%arg0: i32) -> (i32, i32) {
    %c0_i32 = arith.constant 0 : i32
    %c0_i32_0 = arith.constant 0 : i32
    return %arg0, %c0_i32 : i32, i32
  }
  func.func @transform_1(%arg0: i32) -> (i32, i32) {
    %c0_i32 = arith.constant 0 : i32
    %c0_i32_0 = arith.constant 0 : i32
    return %arg0, %c0_i32 : i32, i32
  }
  func.func @transform_2(%arg0: i32) -> (i32, i32) {
    %c0_i32 = arith.constant 0 : i32
    %c0_i32_0 = arith.constant 0 : i32
    %c0_i32_1 = arith.constant 0 : i32
    return %c0_i32, %c0_i32_0 : i32, i32
  }
  func.func @transform_3(%arg0: i32) -> (i32, i32) {
    %c0_i32 = arith.constant 0 : i32
    %c0_i32_0 = arith.constant 0 : i32
    %c0_i32_1 = arith.constant 0 : i32
    return %c0_i32, %c0_i32_0 : i32, i32
  }
  func.func @transform_4(%arg0: i32) -> (i32, i32) {
    %c0_i32 = arith.constant 0 : i32
    %c0_i32_0 = arith.constant 0 : i32
    return %arg0, %c0_i32 : i32, i32
  }
}

module attributes {stable_mosaic.version = 11 : i64} {
  func.func @_gated_control_kernel(%arg0: i32, %arg1: memref<8x32xf32, #tpu.memory_space<vmem>>, %arg2: memref<8x32xf32, #tpu.memory_space<vmem>>, %arg3: memref<32x32xf32, #tpu.memory_space<vmem>>, %arg4: memref<32x32xf32, #tpu.memory_space<vmem>>, %arg5: memref<8x32xf32, #tpu.memory_space<vmem>>) attributes {dimension_semantics = [#tpu.dimension_semantics<parallel>], iteration_bounds = array<i64: 2>, scalar_prefetch = 0 : i64, scratch_operands = 0 : i64, tpu.core_type = #tpu.core_type<tc>, window_params = [{transform_indices = @transform_0, window_bounds = array<i64: 8, 32>}, {transform_indices = @transform_1, window_bounds = array<i64: 8, 32>}, {pipeline_mode = #tpu.pipeline_mode<synchronous>, transform_indices = @transform_2, window_bounds = array<i64: 32, 32>}, {pipeline_mode = #tpu.pipeline_mode<synchronous>, transform_indices = @transform_3, window_bounds = array<i64: 32, 32>}, {transform_indices = @transform_4, window_bounds = array<i64: 8, 32>}]} {
    %c0 = arith.constant 0 : index
    %c0_0 = arith.constant 0 : index
    %0 = vector.load %arg1[%c0, %c0_0] : memref<8x32xf32, #tpu.memory_space<vmem>>, vector<8x32xf32>
    %c0_1 = arith.constant 0 : index
    %c0_2 = arith.constant 0 : index
    %1 = vector.load %arg2[%c0_1, %c0_2] : memref<8x32xf32, #tpu.memory_space<vmem>>, vector<8x32xf32>
    %c0_3 = arith.constant 0 : index
    %c0_4 = arith.constant 0 : index
    %2 = vector.load %arg3[%c0_3, %c0_4] : memref<32x32xf32, #tpu.memory_space<vmem>>, vector<32x32xf32>
    %cst = arith.constant dense<0.000000e+00> : vector<8x32xf32>
    %3 = tpu.matmul %0, %2, %cst {dimension_numbers = #tpu.dot_dimension_numbers<[1], [1], [0], [0], [0, 0, 1, 0], [], []>} : vector<8x32xf32>, vector<32x32xf32>, vector<8x32xf32> -> vector<8x32xf32>
    %c0_5 = arith.constant 0 : index
    %c0_6 = arith.constant 0 : index
    %4 = vector.load %arg4[%c0_5, %c0_6] : memref<32x32xf32, #tpu.memory_space<vmem>>, vector<32x32xf32>
    %cst_7 = arith.constant dense<0.000000e+00> : vector<8x32xf32>
    %5 = tpu.matmul %1, %4, %cst_7 {dimension_numbers = #tpu.dot_dimension_numbers<[1], [1], [0], [0], [0, 0, 1, 0], [], []>} : vector<8x32xf32>, vector<32x32xf32>, vector<8x32xf32> -> vector<8x32xf32>
    %6 = arith.addf %3, %5 : vector<8x32xf32>
    %7 = arith.negf %6 : vector<8x32xf32>
    %8 = math.exp %7 : vector<8x32xf32>
    %cst_8 = arith.constant 1.000000e+00 : f32
    %9 = vector.broadcast %cst_8 : f32 to vector<8x32xf32>
    %10 = arith.addf %9, %8 : vector<8x32xf32>
    %11 = arith.divf %9, %10 : vector<8x32xf32>
    %12 = arith.subf %0, %1 : vector<8x32xf32>
    %13 = arith.mulf %11, %12 : vector<8x32xf32>
    %14 = arith.addf %1, %13 : vector<8x32xf32>
    %c0_9 = arith.constant 0 : index
    %c0_10 = arith.constant 0 : index
    %15 = vector.load %arg5[%c0_9, %c0_10] : memref<8x32xf32, #tpu.memory_space<vmem>>, vector<8x32xf32>
    tpu.vector_store %arg5[%c0_9, %c0_10], %14 {strides = array<i32>} : memref<8x32xf32, #tpu.memory_space<vmem>>, vector<8x32xf32>,
    return
  }
  func.func @transform_0(%arg0: i32) -> (i32, i32) {
    %c0_i32 = arith.constant 0 : i32
    %c0_i32_0 = arith.constant 0 : i32
    return %arg0, %c0_i32 : i32, i32
  }
  func.func @transform_1(%arg0: i32) -> (i32, i32) {
    %c0_i32 = arith.constant 0 : i32
    %c0_i32_0 = arith.constant 0 : i32
    return %arg0, %c0_i32 : i32, i32
  }
  func.func @transform_2(%arg0: i32) -> (i32, i32) {
    %c0_i32 = arith.constant 0 : i32
    %c0_i32_0 = arith.constant 0 : i32
    %c0_i32_1 = arith.constant 0 : i32
    return %c0_i32, %c0_i32_0 : i32, i32
  }
  func.func @transform_3(%arg0: i32) -> (i32, i32) {
    %c0_i32 = arith.constant 0 : i32
    %c0_i32_0 = arith.constant 0 : i32
    %c0_i32_1 = arith.constant 0 : i32
    return %c0_i32, %c0_i32_0 : i32, i32
  }
  func.func @transform_4(%arg0: i32) -> (i32, i32) {
    %c0_i32 = arith.constant 0 : i32
    %c0_i32_0 = arith.constant 0 : i32
    return %arg0, %c0_i32 : i32, i32
  }
}

</mosaic_0001>

<bundles_post_ra>
// kernel: tpu_custom_call.1
= control target key start
LH: loop header
LB: loop body
LE: loop exit
PB: predicated region body
PF: predicated region fallthrough
CT: control target
= control target key end

     0   :  { %s1050_s0 = inlined_call_operand.hbm [shape: f32[16,32], index: 0, kind: input, shape index: {}]   ;;  %s1051_s1 = inlined_call_operand.hbm [shape: f32[16,32], index: 1, kind: input, shape index: {}]   ;;  %s1052_s2 = inlined_call_operand.hbm [shape: f32[32,32], index: 2, kind: input, shape index: {}]   ;;  %s1053_s3 = inlined_call_operand.hbm [shape: f32[32,32], index: 3, kind: input, shape index: {}]   ;;  %s1054_s4 = inlined_call_operand.hbm [shape: f32[16,32], index: 4, kind: output, shape index: {}]  }
   0x1   :  { %1055 = sst [smem:[#allocation17_spill]] %s1052_s2 }
   0x2   :  { %1056 = sst [smem:[#allocation18_spill]] %s1053_s3 }
   0x3   :  { %9 = vsyncpa [#allocation3], 0 }
   0x4   :  { %11 = vsyncpa [#allocation3 + $0x1], 0 }
   0x5   :  { %12 = vsyncpa [#allocation6], 0 }
   0x6   :  { %14 = vsyncpa [#allocation6 + $0x1], 0 }
   0x7   :  { %15 = vsyncpa [#allocation9], 0 }
   0x8   :  { %16 = vsyncpa [#allocation4], 0 }
   0x9   :  { %18 = vsyncpa [#allocation4 + $0x1], 0  ;;  %s856_s15 = smov 0   ;;  %s858_s16 = smov 0  }
   0xa   :  { %s860_s17 = smov 0   ;;  %s862_s18 = smov 0  }
   0xb LB: > { %s1057_s2 = sld [smem:[#allocation17_spill]]  ;;  %s880_s22 = sadd.s32 4294967295, %s825_s18   ;;  %s825_s18 = sphi %s862_s18, %s1071_s18   ;;  %s821_s17 = sphi %s860_s17, %s1070_s17   ;;  %s817_s16 = sphi %s858_s16, %s1069_s16   ;;  %s813_s15 = sphi %s856_s15, %s1068_s15  }
   0xc   : > { %p520_p0 = scmp.ge.s32.totalorder %s825_s18, 1  ;;  %p45_p1 = scmp.eq.s32.totalorder %s880_s22, 0 }
   0xd   : > { %p149_p2 = scmp.lt.s32.totalorder %s825_s18, 3  ;;  %s827_s24 = smov [#allocation7]  }
   0xe   : > { %s162_s25 = sshll.u32 %s827_s24, 4  ;;  %s1059_s3 = sld [smem:[#allocation18_spill]]  ;;  %s163_s25 = int_to_ptr.vmem [resolvable:$true] %s162_s25 }
   0xf   : > { %p885_p3 = pnand %p520_p0, %p149_p2  ;;  %s828_s29 = smov [#allocation8]  }
  0x10   : > { %s176_s30 = sshll.u32 %s828_s29, 4  ;;  %s829_s5 = smov 128   ;;  %s177_s30 = int_to_ptr.vmem [resolvable:$true] %s176_s30 }
  0x11   : > { %s160_s21 = sshll.u32 %s1057_s2, 4  ;;  %p563_p4 = pneg %p885_p3  ;;  %s161_s21 = int_to_ptr.hbm [resolvable:$true] %s160_s21 }
  0x12   : > { %s830_s6 = smov 8   ;;  %s519_s7 = sadd.s32 4294967294, %s825_s18  }
  0x13   : > { %p564_p6 = pnand %p563_p4, %p45_p1  ;;  %s899_s8 = sadd.s32 1, %s825_s18  }
  0x14   : > { %s174_s28 = sshll.u32 %s1059_s3, 4  ;;  %s28_s9 = ssub.s32 %s825_s18, %s899_s8  ;;  %s175_s28 = int_to_ptr.hbm [resolvable:$true] %s174_s28 }
  0x15   : > { %566 = dma.hbm_to_vmem [thread:$0]  (!%p564_p6), %s161_s21, 512, %s163_s25, [#allocation6], %s829_s5, %s829_s5, %s830_s6  }
  0x16   : > { %569 = dma.hbm_to_vmem [thread:$0]  (!%p564_p6), %s175_s28, 512, %s177_s30, [#allocation9], %s829_s5, %s829_s5, %s830_s6  }
  0x17   : > { %s31_s10 = sadd.s32 1, %s821_s17  ;;  %p29_p7 = scmp.eq.s32.totalorder %s28_s9, 0 }
  0x18   : > { %p38_p8 = scmp.ne.s32.totalorder %s821_s17, %s817_s16  ;;  %p39_p9 = scmp.eq.s32.totalorder %s825_s18, 0 }
  0x19   : > { %p44_p10 = scmp.ne.s32.totalorder %s817_s16, %s813_s15  ;;  %p136_p13 = scmp.eq.s32.totalorder %s880_s22, 1 }
  0x1a   : > { %s910_s11 = scalar_select %p29_p7, %s821_s17, %s31_s10  }
  0x1b   : > { %p912_p11 = por %p39_p9, %p38_p8  ;;  %p918_p12 = por %p45_p1, %p44_p10 }
  0x1c   : > { %1060 = sst [smem:[#allocation16_spill]] %s910_s11  ;;  %p142_p0 = scmp.eq.s32.totalorder %s519_s7, 1 }
  0x1d   : > { %p583_p2 = scmp.lt.s32.totalorder %s825_s18, 2  ;;  %s190_s14 = sand.u32 1, %s821_s17  }
  0x1e   : > { %p925_p4 = por %p136_p13, %p38_p8  ;;  %p929_p6 = por %p142_p0, %p44_p10 }
  0x1f   : > { %s933_s21 = sshll.u32 %s190_s14, 3  ;;  %s525_s24 = sshll.u32 %s825_s18, 3 }
  0x20   : > { %s198_s27 = scalar_lea.hbm %s1050_s0, %s525_s24  ;;  %s194_s28 = scalar_lea.vmem [#allocation2], %s933_s21 }
  0x21   : > { %s202_s29 = sshll.u32 %s194_s28, 4  ;;  %s200_s30 = sshll.u32 %s198_s27, 4  ;;  %s203_s29 = int_to_ptr.vmem [resolvable:$true] %s202_s29  ;;  %s201_s30 = int_to_ptr.hbm [resolvable:$true] %s200_s30 }
  0x22   : > { %p942_p7 = pnand %p583_p2, %p912_p11  ;;  %s217_s9 = scalar_lea.hbm %s1051_s1, %s525_s24 }
  0x23   : > { %s209_s10 = sand.u32 1, %s825_s18   ;;  %s191_s2 = scalar_lea.sflag [#allocation3], %s190_s14 }
  0x24   : > { %s687_s25 = sshra.s32 %s201_s30, 4  ;;  %p691_p9 = pneg %p942_p7  ;;  %s688_s25 = int_to_ptr.hbm [resolvable:$true] %s687_s25 }
  0x25   : > { %s689_s26 = scalar_lea.hbm %s688_s25, 8  ;;  %s694_s28 = scalar_lea.hbm %s1050_s0, 16 }
  0x26   : > { %p690_p8 = scmp.ne.s32.totalorder %s688_s25, %s689_s26  ;;  %p695_p13 = scmp.lt.s32.totalorder %s688_s25, %s1050_s0 }
  0x27   : > { %p696_p0 = scmp.lt.s32.totalorder %s694_s28, %s689_s26 }
  0x28   : > { %p692_p10 = pnand %p691_p9, %p690_p8 }
  0x29   : > { %p697_p2 = por %p696_p0, %p695_p13 }
  0x2a   : > { %p693_p11 = pneg %p692_p10 }
  0x2c   : > { %p698_p5 = pnand %p697_p2, %p693_p11 }
  0x2e   : > { %701 = shalt.err (!%p698_p5)
}
  0x2f   : > { %573 = dma.hbm_to_vmem [thread:$0]  (!%p942_p7), %s201_s30, 128, %s203_s29, %s191_s2  }
  0x30   : > { %s219_s14 = sshll.u32 %s217_s9, 4  ;;  %s213_s24 = scalar_lea.vmem [#allocation5], %s933_s21  ;;  %s220_s14 = int_to_ptr.hbm [resolvable:$true] %s219_s14 }
  0x31   : > { %s221_s3 = sshll.u32 %s213_s24, 4  ;;  %s210_s12 = scalar_lea.sflag [#allocation6], %s209_s10  ;;  %s222_s3 = int_to_ptr.vmem [resolvable:$true] %s221_s3 }
  0x32   : > { %s717_s27 = sshra.s32 %s220_s14, 4  ;;  %s724_s28 = scalar_lea.hbm %s1051_s1, 16  ;;  %s718_s27 = int_to_ptr.hbm [resolvable:$true] %s717_s27 }
  0x33   : > { %s719_s11 = scalar_lea.hbm %s718_s27, 8  ;;  %p725_p5 = scmp.lt.s32.totalorder %s718_s27, %s1051_s1 }
  0x34   : > { %p720_p8 = scmp.ne.s32.totalorder %s718_s27, %s719_s11  ;;  %p726_p13 = scmp.lt.s32.totalorder %s724_s28, %s719_s11 }
  0x36   : > { %p722_p10 = pnand %p720_p8, %p691_p9  ;;  %p727_p0 = por %p726_p13, %p725_p5 }
  0x38   : > { %p723_p11 = pneg %p722_p10 }
  0x3a   : > { %p728_p2 = pnand %p727_p0, %p723_p11 }
  0x3c   : > { %731 = shalt.err (!%p728_p2)
}
  0x3d   : > { %576 = dma.hbm_to_vmem [thread:$0]  (!%p942_p7), %s220_s14, 128, %s222_s3, %s210_s12  }
  0x3e   : > { %230 = sbr.rel (%p885_p3) target bundleno = 255 (0xff), region = 36  ;;  %s978_s21 = sand.u32 (!%p885_p3), 1, %s817_s16  }
  0x3f   : > { %s981_s29 = sshll.u32 (!%p885_p3), %s978_s21, 3  ;;  %s233_s30 = scalar_lea.sflag (!%p885_p3), [#allocation3], %s978_s21 }
  0x40   : > { %s236_s11 = scalar_lea.vmem (!%p885_p3), [#allocation2], %s981_s29 }
  0x43   : > { %792 = dma.done.wait (%p918_p12), %s233_s30, 128  }
  0x44   : > { %794 = vsyncadd (%p918_p12), %s233_s30, 4294967168  ;;  %s242_s3 = sand.u32 1, %s880_s22   ;;  %s246_s5 = scalar_lea.vmem [#allocation5], %s981_s29 }
  0x45   : > { %s243_s23 = scalar_lea.sflag [#allocation6], %s242_s3 }
  0x46   : > { %796 = dma.done.wait (%p918_p12), %s243_s23, 128  }
  0x47   : > { %798 = vsyncadd (%p918_p12), %s243_s23, 4294967168 }
  0x48   : > { %800 = dma.done.wait (%p45_p1), [#allocation6], 512  }
  0x49   : > { %802 = vsyncadd (%p45_p1), [#allocation6], 4294966784 }
  0x4a   : > { %804 = dma.done.wait (%p45_p1), [#allocation9], 512  }
  0x4b   : > { %806 = vsyncadd (%p45_p1), [#allocation9], 4294966784  ;;  %vm297_vm0 = vcmask 261120   ;;  %v296_v0 = vld [vmem:[#allocation8 + $0x18] sm:$0xff]  ;;  %v295_v2 = vld [vmem:[#allocation8 + $0x10] sm:$0xff]  ;;  %s546_s13 = sshll.u32 %s880_s22, 3 }
  0x4c   : > { %v292_v1 = vld [vmem:[#allocation7 + $0x18] sm:$0xff]  ;;  %534 = vmatpush.xpose.msk.msra.mxu0 %vm297_vm0, %v296_v0  ;;  %v291_v3 = vld [vmem:[#allocation7 + $0x10] sm:$0xff]  ;;  %v294_v4 = vld [vmem:[#allocation8 + $0x8] sm:$0xff]  ;;  %s402_s7 = scalar_lea.hbm %s1054_s4, %s546_s13  ;;  %s286_s14 = scalar_lea.vmem [#allocation10], %s981_s29 }
  0x4d   : > { %539 = vmatpush.xpose.msk.msra.mxu1 %vm297_vm0, %v292_v1  ;;  %v290_v5 = vld [vmem:[#allocation7 + $0x8] sm:$0xff]  ;;  %v293_v6 = vld [vmem:[#allocation8] sm:$0xff]  ;;  %v288_v8 = vld [vmem:[%s246_s5] sm:$0xff]  ;;  %s404_s24 = sshll.u32 %s286_s14, 4  ;;  %s406_s22 = sshll.u32 %s402_s7, 4  ;;  %s405_s24 = int_to_ptr.vmem [resolvable:$true] %s404_s24  ;;  %s407_s22 = int_to_ptr.hbm [resolvable:$true] %s406_s22 }
  0x4e   : > { %v289_v7 = vld [vmem:[#allocation7] sm:$0xff]  ;;  %s392_s12 = scalar_lea.sflag [#allocation4], %s978_s21  ;;  %s761_s27 = sshra.s32 %s407_s22, 4  ;;  %s762_s27 = int_to_ptr.hbm [resolvable:$true] %s761_s27 }
  0x4f   : > { %v287_v9 = vld [vmem:[%s236_s11] sm:$0xff]  ;;  %s763_s25 = scalar_lea.hbm %s762_s27, 8  ;;  %s767_s6 = scalar_lea.hbm %s1054_s4, 16 }
  0x50   : > { %535 = vmatpush.xpose.msk.msra.mxu0 %vm297_vm0, %v295_v2  ;;  %v387_v22 = vsub.f32 %v287_v9, %v288_v8  ;;  %p764_p1 = scmp.ne.s32.totalorder %s762_s27, %s763_s25  ;;  %p768_p7 = scmp.lt.s32.totalorder %s762_s27, %s1054_s4 }
  0x51   : > { %540 = vmatpush.xpose.msk.msra.mxu1 %vm297_vm0, %v291_v3  ;;  %p769_p9 = scmp.lt.s32.totalorder %s767_s6, %s763_s25 }
  0x52   : > { %p765_p3 = pnand %p764_p1, %p925_p4 }
  0x53   : > { %p770_p8 = por %p769_p9, %p768_p7 }
  0x54   : > { %536 = vmatpush.xpose.msk.msra.mxu0 %vm297_vm0, %v294_v4  ;;  %p766_p12 = pneg %p765_p3 }
  0x55   : > { %541 = vmatpush.xpose.msk.msra.mxu1 %vm297_vm0, %v290_v5 }
  0x56   : > { %p771_p10 = pnand %p770_p8, %p766_p12 }
  0x58   : > { %537 = vmatpush.xpose.msk.msra.mxu0 %vm297_vm0, %v293_v6 }
  0x59   : > { %542 = vmatpush.xpose.msk.msra.mxu1 %vm297_vm0, %v289_v7 }
  0x5b   : > { %538 = vmatmul.msk.f32.vlgmr.msra.gmra.mxu0 %vm297_vm0, %v288_v8 }
  0x5c   : > { %543 = vmatmul.msk.f32.vlgmr.msra.gmra.mxu1 %vm297_vm0, %v287_v9 }
  0xd8   : > { %v330_v10 = vpop.f32.mrf.mxu0 }
  0xd9   : > { %v365_v11 = vpop.f32.mrf.mxu1 }
  0xda   : > { %v366_v12 = vadd.f32 %v365_v11, %v330_v10 }
  0xdc   : > { %v544_v13 = vmul.f32 -1.442695, %v366_v12 }
  0xde   : > { %623 = vpow2.f32 %v544_v13 }
  0xe4   : > { %v624_v14 = vpop.eup %623 }
  0xe5   : > { %v371_v15 = vadd.f32 1.0, %v624_v14 }
  0xe7   : > { %625 = vrcp.f32 %v371_v15  ;;  %v383_v19 = vand.u32 2147483648, %v371_v15  ;;  %v381_v21 = vand.u32 2147483647, %v371_v15  ;;  %vm377_vm2 = vweird.f32 %v371_v15 }
  0xe9   : > { %v384_v24 = vor.u32 1.1754944e-38, %v383_v19  ;;  %vm382_vm4 = vcmp.eq.f32.partialorder %v381_v21, 8.507059e+37 }
  0xed   : > { %v626_v16 = vpop.eup %625 }
  0xee   : > { %v373_v17 = vmul.f32 %v626_v16, %v371_v15  ;;  %vm378_vm1 = vweird.f32 %v626_v16 }
  0xef   : > { %vm379_vm3 = vmor %vm377_vm2, %vm378_vm1 }
  0xf0   : > { %v374_v18 = vsub.f32 1.0, %v373_v17 }
  0xf2   : > { %v375_v20 = vmul.f32 %v626_v16, %v374_v18 }
  0xf4   : > { %v376_v23 = vadd.f32 %v626_v16, %v375_v20 }
  0xf6   : > { %v380_v25 = vsel %vm379_vm3, %v626_v16, %v376_v23 }
  0xf7   : > { %v385_v26 = vsel %vm382_vm4, %v384_v24, %v380_v25 }
  0xf8   : > { %v388_v27 = vmul.f32 %v387_v22, %v385_v26 }
  0xfa   : > { %v389_v28 = vadd.f32 %v388_v27, %v288_v8 }
  0xfc   : > { %390 = vst.msk [vmem:[%s286_s14] sm:$0xff] %vm297_vm0, %v389_v28 }
  0xfd   : > { %774 = shalt.err (!%p771_p10)
}
  0xfe   : > { %561 = dma.vmem_to_hbm [thread:$0]  (%p925_p4), %s405_s24, 128, %s407_s22, %s392_s12  }
  0xff PF: > { %s418_s21 = sand.u32 1, %s813_s15   ;;  %p1066_p11 = scmp.ge.s32.totalorder %s825_s18, 2 }
 0x100   : > { %s419_s30 = scalar_lea.sflag [#allocation4], %s418_s21 }
 0x101   : > { %p578_p5 = pnand %p1066_p11, %p929_p6 }
 0x103   : > { %p579_p13 = pneg %p578_p5 }
 0x105   : > { %808 = dma.done.wait (%p579_p13), %s419_s30, 128  }
 0x106   : > { %810 = vsyncadd (%p579_p13), %s419_s30, 4294967168  ;;  %s1067_s11 = sld [smem:[#allocation16_spill]]  ;;  %p21_p0 = scmp.ge.s32.totalorder %s899_s8, 4  }
 0x107   : > { %s1068_s15 = smov %s817_s16  ;;  %s1069_s16 = smov %s821_s17 }
 0x108   : > { %s1071_s18 = smov %s899_s8  ;;  %23 = sbr.rel (!%p21_p0) target bundleno = 11 (0xb), region = 102 }
 0x10c   : > { %s1070_s17 = smov %s1067_s11 }
 0x10d   :  { %425 = vsyncpa [#allocation3], 1 }
 0x10e   :  { %427 = vsyncpa [#allocation3 + $0x1], 1 }
 0x10f   :  { %428 = vsyncpa [#allocation6], 1 }
 0x110   :  { %430 = vsyncpa [#allocation6 + $0x1], 1 }
 0x111   :  { %431 = vsyncpa [#allocation9], 1 }
 0x112   :  { %432 = vsyncpa [#allocation4], 1 }
 0x113   :  { %434 = vsyncpa [#allocation4 + $0x1], 1 }

// kernel: tpu_custom_call.1
= control target key start
LH: loop header
LB: loop body
LE: loop exit
PB: predicated region body
PF: predicated region fallthrough
CT: control target
= control target key end

     0   :  { %s1050_s0 = inlined_call_operand.hbm [shape: f32[16,32], index: 0, kind: input, shape index: {}]   ;;  %s1051_s1 = inlined_call_operand.hbm [shape: f32[16,32], index: 1, kind: input, shape index: {}]   ;;  %s1052_s2 = inlined_call_operand.hbm [shape: f32[32,32], index: 2, kind: input, shape index: {}]   ;;  %s1053_s3 = inlined_call_operand.hbm [shape: f32[32,32], index: 3, kind: input, shape index: {}]   ;;  %s1054_s4 = inlined_call_operand.hbm [shape: f32[16,32], index: 4, kind: output, shape index: {}]  }
   0x1   :  { %1055 = sst [smem:[#allocation17_spill]] %s1052_s2 }
   0x2   :  { %1056 = sst [smem:[#allocation18_spill]] %s1053_s3 }
   0x3   :  { %9 = vsyncpa [#allocation3], 0 }
   0x4   :  { %11 = vsyncpa [#allocation3 + $0x1], 0 }
   0x5   :  { %12 = vsyncpa [#allocation6], 0 }
   0x6   :  { %14 = vsyncpa [#allocation6 + $0x1], 0 }
   0x7   :  { %15 = vsyncpa [#allocation9], 0 }
   0x8   :  { %16 = vsyncpa [#allocation4], 0 }
   0x9   :  { %18 = vsyncpa [#allocation4 + $0x1], 0  ;;  %s856_s15 = smov 0   ;;  %s858_s16 = smov 0  }
   0xa   :  { %s860_s17 = smov 0   ;;  %s862_s18 = smov 0  }
   0xb LB: > { %s1057_s2 = sld [smem:[#allocation17_spill]]  ;;  %s880_s22 = sadd.s32 4294967295, %s825_s18   ;;  %s825_s18 = sphi %s862_s18, %s1071_s18   ;;  %s821_s17 = sphi %s860_s17, %s1070_s17   ;;  %s817_s16 = sphi %s858_s16, %s1069_s16   ;;  %s813_s15 = sphi %s856_s15, %s1068_s15  }
   0xc   : > { %p520_p0 = scmp.ge.s32.totalorder %s825_s18, 1  ;;  %p45_p1 = scmp.eq.s32.totalorder %s880_s22, 0 }
   0xd   : > { %p149_p2 = scmp.lt.s32.totalorder %s825_s18, 3  ;;  %s827_s24 = smov [#allocation7]  }
   0xe   : > { %s162_s25 = sshll.u32 %s827_s24, 4  ;;  %s1059_s3 = sld [smem:[#allocation18_spill]]  ;;  %s163_s25 = int_to_ptr.vmem [resolvable:$true] %s162_s25 }
   0xf   : > { %p885_p3 = pnand %p520_p0, %p149_p2  ;;  %s828_s29 = smov [#allocation8]  }
  0x10   : > { %s176_s30 = sshll.u32 %s828_s29, 4  ;;  %s829_s5 = smov 128   ;;  %s177_s30 = int_to_ptr.vmem [resolvable:$true] %s176_s30 }
  0x11   : > { %s160_s21 = sshll.u32 %s1057_s2, 4  ;;  %p563_p4 = pneg %p885_p3  ;;  %s161_s21 = int_to_ptr.hbm [resolvable:$true] %s160_s21 }
  0x12   : > { %s830_s6 = smov 8   ;;  %s519_s7 = sadd.s32 4294967294, %s825_s18  }
  0x13   : > { %p564_p6 = pnand %p563_p4, %p45_p1  ;;  %s899_s8 = sadd.s32 1, %s825_s18  }
  0x14   : > { %s174_s28 = sshll.u32 %s1059_s3, 4  ;;  %s28_s9 = ssub.s32 %s825_s18, %s899_s8  ;;  %s175_s28 = int_to_ptr.hbm [resolvable:$true] %s174_s28 }
  0x15   : > { %566 = dma.hbm_to_vmem [thread:$0]  (!%p564_p6), %s161_s21, 512, %s163_s25, [#allocation6], %s829_s5, %s829_s5, %s830_s6  }
  0x16   : > { %569 = dma.hbm_to_vmem [thread:$0]  (!%p564_p6), %s175_s28, 512, %s177_s30, [#allocation9], %s829_s5, %s829_s5, %s830_s6  }
  0x17   : > { %s31_s10 = sadd.s32 1, %s821_s17  ;;  %p29_p7 = scmp.eq.s32.totalorder %s28_s9, 0 }
  0x18   : > { %p38_p8 = scmp.ne.s32.totalorder %s821_s17, %s817_s16  ;;  %p39_p9 = scmp.eq.s32.totalorder %s825_s18, 0 }
  0x19   : > { %p44_p10 = scmp.ne.s32.totalorder %s817_s16, %s813_s15  ;;  %p136_p13 = scmp.eq.s32.totalorder %s880_s22, 1 }
  0x1a   : > { %s910_s11 = scalar_select %p29_p7, %s821_s17, %s31_s10  }
  0x1b   : > { %p912_p11 = por %p39_p9, %p38_p8  ;;  %p918_p12 = por %p45_p1, %p44_p10 }
  0x1c   : > { %1060 = sst [smem:[#allocation16_spill]] %s910_s11  ;;  %p142_p0 = scmp.eq.s32.totalorder %s519_s7, 1 }
  0x1d   : > { %p583_p2 = scmp.lt.s32.totalorder %s825_s18, 2  ;;  %s190_s14 = sand.u32 1, %s821_s17  }
  0x1e   : > { %p925_p4 = por %p136_p13, %p38_p8  ;;  %p929_p6 = por %p142_p0, %p44_p10 }
  0x1f   : > { %s933_s21 = sshll.u32 %s190_s14, 3  ;;  %s525_s24 = sshll.u32 %s825_s18, 3 }
  0x20   : > { %s198_s27 = scalar_lea.hbm %s1050_s0, %s525_s24  ;;  %s194_s28 = scalar_lea.vmem [#allocation2], %s933_s21 }
  0x21   : > { %s202_s29 = sshll.u32 %s194_s28, 4  ;;  %s200_s30 = sshll.u32 %s198_s27, 4  ;;  %s203_s29 = int_to_ptr.vmem [resolvable:$true] %s202_s29  ;;  %s201_s30 = int_to_ptr.hbm [resolvable:$true] %s200_s30 }
  0x22   : > { %p942_p7 = pnand %p583_p2, %p912_p11  ;;  %s217_s9 = scalar_lea.hbm %s1051_s1, %s525_s24 }
  0x23   : > { %s209_s10 = sand.u32 1, %s825_s18   ;;  %s191_s2 = scalar_lea.sflag [#allocation3], %s190_s14 }
  0x24   : > { %s687_s25 = sshra.s32 %s201_s30, 4  ;;  %p691_p9 = pneg %p942_p7  ;;  %s688_s25 = int_to_ptr.hbm [resolvable:$true] %s687_s25 }
  0x25   : > { %s689_s26 = scalar_lea.hbm %s688_s25, 8  ;;  %s694_s28 = scalar_lea.hbm %s1050_s0, 16 }
  0x26   : > { %p690_p8 = scmp.ne.s32.totalorder %s688_s25, %s689_s26  ;;  %p695_p13 = scmp.lt.s32.totalorder %s688_s25, %s1050_s0 }
  0x27   : > { %p696_p0 = scmp.lt.s32.totalorder %s694_s28, %s689_s26 }
  0x28   : > { %p692_p10 = pnand %p691_p9, %p690_p8 }
  0x29   : > { %p697_p2 = por %p696_p0, %p695_p13 }
  0x2a   : > { %p693_p11 = pneg %p692_p10 }
  0x2c   : > { %p698_p5 = pnand %p697_p2, %p693_p11 }
  0x2e   : > { %701 = shalt.err (!%p698_p5)
}
  0x2f   : > { %573 = dma.hbm_to_vmem [thread:$0]  (!%p942_p7), %s201_s30, 128, %s203_s29, %s191_s2  }
  0x30   : > { %s219_s14 = sshll.u32 %s217_s9, 4  ;;  %s213_s24 = scalar_lea.vmem [#allocation5], %s933_s21  ;;  %s220_s14 = int_to_ptr.hbm [resolvable:$true] %s219_s14 }
  0x31   : > { %s221_s3 = sshll.u32 %s213_s24, 4  ;;  %s210_s12 = scalar_lea.sflag [#allocation6], %s209_s10  ;;  %s222_s3 = int_to_ptr.vmem [resolvable:$true] %s221_s3 }
  0x32   : > { %s717_s27 = sshra.s32 %s220_s14, 4  ;;  %s724_s28 = scalar_lea.hbm %s1051_s1, 16  ;;  %s718_s27 = int_to_ptr.hbm [resolvable:$true] %s717_s27 }
  0x33   : > { %s719_s11 = scalar_lea.hbm %s718_s27, 8  ;;  %p725_p5 = scmp.lt.s32.totalorder %s718_s27, %s1051_s1 }
  0x34   : > { %p720_p8 = scmp.ne.s32.totalorder %s718_s27, %s719_s11  ;;  %p726_p13 = scmp.lt.s32.totalorder %s724_s28, %s719_s11 }
  0x36   : > { %p722_p10 = pnand %p720_p8, %p691_p9  ;;  %p727_p0 = por %p726_p13, %p725_p5 }
  0x38   : > { %p723_p11 = pneg %p722_p10 }
  0x3a   : > { %p728_p2 = pnand %p727_p0, %p723_p11 }
  0x3c   : > { %731 = shalt.err (!%p728_p2)
}
  0x3d   : > { %576 = dma.hbm_to_vmem [thread:$0]  (!%p942_p7), %s220_s14, 128, %s222_s3, %s210_s12  }
  0x3e   : > { %230 = sbr.rel (%p885_p3) target bundleno = 255 (0xff), region = 36  ;;  %s978_s21 = sand.u32 (!%p885_p3), 1, %s817_s16  }
  0x3f   : > { %s981_s29 = sshll.u32 (!%p885_p3), %s978_s21, 3  ;;  %s233_s30 = scalar_lea.sflag (!%p885_p3), [#allocation3], %s978_s21 }
  0x40   : > { %s236_s11 = scalar_lea.vmem (!%p885_p3), [#allocation2], %s981_s29 }
  0x43   : > { %792 = dma.done.wait (%p918_p12), %s233_s30, 128  }
  0x44   : > { %794 = vsyncadd (%p918_p12), %s233_s30, 4294967168  ;;  %s242_s3 = sand.u32 1, %s880_s22   ;;  %s246_s5 = scalar_lea.vmem [#allocation5], %s981_s29 }
  0x45   : > { %s243_s23 = scalar_lea.sflag [#allocation6], %s242_s3 }
  0x46   : > { %796 = dma.done.wait (%p918_p12), %s243_s23, 128  }
  0x47   : > { %798 = vsyncadd (%p918_p12), %s243_s23, 4294967168 }
  0x48   : > { %800 = dma.done.wait (%p45_p1), [#allocation6], 512  }
  0x49   : > { %802 = vsyncadd (%p45_p1), [#allocation6], 4294966784 }
  0x4a   : > { %804 = dma.done.wait (%p45_p1), [#allocation9], 512  }
  0x4b   : > { %806 = vsyncadd (%p45_p1), [#allocation9], 4294966784  ;;  %vm297_vm0 = vcmask 261120   ;;  %v296_v0 = vld [vmem:[#allocation8 + $0x18] sm:$0xff]  ;;  %v295_v2 = vld [vmem:[#allocation8 + $0x10] sm:$0xff]  ;;  %s546_s13 = sshll.u32 %s880_s22, 3 }
  0x4c   : > { %v292_v1 = vld [vmem:[#allocation7 + $0x18] sm:$0xff]  ;;  %534 = vmatpush.xpose.msk.msra.mxu0 %vm297_vm0, %v296_v0  ;;  %v291_v3 = vld [vmem:[#allocation7 + $0x10] sm:$0xff]  ;;  %v294_v4 = vld [vmem:[#allocation8 + $0x8] sm:$0xff]  ;;  %s402_s7 = scalar_lea.hbm %s1054_s4, %s546_s13  ;;  %s286_s14 = scalar_lea.vmem [#allocation10], %s981_s29 }
  0x4d   : > { %539 = vmatpush.xpose.msk.msra.mxu1 %vm297_vm0, %v292_v1  ;;  %v290_v5 = vld [vmem:[#allocation7 + $0x8] sm:$0xff]  ;;  %v293_v6 = vld [vmem:[#allocation8] sm:$0xff]  ;;  %v288_v8 = vld [vmem:[%s246_s5] sm:$0xff]  ;;  %s404_s24 = sshll.u32 %s286_s14, 4  ;;  %s406_s22 = sshll.u32 %s402_s7, 4  ;;  %s405_s24 = int_to_ptr.vmem [resolvable:$true] %s404_s24  ;;  %s407_s22 = int_to_ptr.hbm [resolvable:$true] %s406_s22 }
  0x4e   : > { %v289_v7 = vld [vmem:[#allocation7] sm:$0xff]  ;;  %s392_s12 = scalar_lea.sflag [#allocation4], %s978_s21  ;;  %s761_s27 = sshra.s32 %s407_s22, 4  ;;  %s762_s27 = int_to_ptr.hbm [resolvable:$true] %s761_s27 }
  0x4f   : > { %v287_v9 = vld [vmem:[%s236_s11] sm:$0xff]  ;;  %s763_s25 = scalar_lea.hbm %s762_s27, 8  ;;  %s767_s6 = scalar_lea.hbm %s1054_s4, 16 }
  0x50   : > { %535 = vmatpush.xpose.msk.msra.mxu0 %vm297_vm0, %v295_v2  ;;  %v387_v22 = vsub.f32 %v287_v9, %v288_v8  ;;  %p764_p1 = scmp.ne.s32.totalorder %s762_s27, %s763_s25  ;;  %p768_p7 = scmp.lt.s32.totalorder %s762_s27, %s1054_s4 }
  0x51   : > { %540 = vmatpush.xpose.msk.msra.mxu1 %vm297_vm0, %v291_v3  ;;  %p769_p9 = scmp.lt.s32.totalorder %s767_s6, %s763_s25 }
  0x52   : > { %p765_p3 = pnand %p764_p1, %p925_p4 }
  0x53   : > { %p770_p8 = por %p769_p9, %p768_p7 }
  0x54   : > { %536 = vmatpush.xpose.msk.msra.mxu0 %vm297_vm0, %v294_v4  ;;  %p766_p12 = pneg %p765_p3 }
  0x55   : > { %541 = vmatpush.xpose.msk.msra.mxu1 %vm297_vm0, %v290_v5 }
  0x56   : > { %p771_p10 = pnand %p770_p8, %p766_p12 }
  0x58   : > { %537 = vmatpush.xpose.msk.msra.mxu0 %vm297_vm0, %v293_v6 }
  0x59   : > { %542 = vmatpush.xpose.msk.msra.mxu1 %vm297_vm0, %v289_v7 }
  0x5b   : > { %538 = vmatmul.msk.f32.vlgmr.msra.gmra.mxu0 %vm297_vm0, %v288_v8 }
  0x5c   : > { %543 = vmatmul.msk.f32.vlgmr.msra.gmra.mxu1 %vm297_vm0, %v287_v9 }
  0xd8   : > { %v330_v10 = vpop.f32.mrf.mxu0 }
  0xd9   : > { %v365_v11 = vpop.f32.mrf.mxu1 }
  0xda   : > { %v366_v12 = vadd.f32 %v365_v11, %v330_v10 }
  0xdc   : > { %v544_v13 = vmul.f32 -1.442695, %v366_v12 }
  0xde   : > { %623 = vpow2.f32 %v544_v13 }
  0xe4   : > { %v624_v14 = vpop.eup %623 }
  0xe5   : > { %v371_v15 = vadd.f32 1.0, %v624_v14 }
  0xe7   : > { %625 = vrcp.f32 %v371_v15  ;;  %v383_v19 = vand.u32 2147483648, %v371_v15  ;;  %v381_v21 = vand.u32 2147483647, %v371_v15  ;;  %vm377_vm2 = vweird.f32 %v371_v15 }
  0xe9   : > { %v384_v24 = vor.u32 1.1754944e-38, %v383_v19  ;;  %vm382_vm4 = vcmp.eq.f32.partialorder %v381_v21, 8.507059e+37 }
  0xed   : > { %v626_v16 = vpop.eup %625 }
  0xee   : > { %v373_v17 = vmul.f32 %v626_v16, %v371_v15  ;;  %vm378_vm1 = vweird.f32 %v626_v16 }
  0xef   : > { %vm379_vm3 = vmor %vm377_vm2, %vm378_vm1 }
  0xf0   : > { %v374_v18 = vsub.f32 1.0, %v373_v17 }
  0xf2   : > { %v375_v20 = vmul.f32 %v626_v16, %v374_v18 }
  0xf4   : > { %v376_v23 = vadd.f32 %v626_v16, %v375_v20 }
  0xf6   : > { %v380_v25 = vsel %vm379_vm3, %v626_v16, %v376_v23 }
  0xf7   : > { %v385_v26 = vsel %vm382_vm4, %v384_v24, %v380_v25 }
  0xf8   : > { %v388_v27 = vmul.f32 %v387_v22, %v385_v26 }
  0xfa   : > { %v389_v28 = vadd.f32 %v388_v27, %v288_v8 }
  0xfc   : > { %390 = vst.msk [vmem:[%s286_s14] sm:$0xff] %vm297_vm0, %v389_v28 }
  0xfd   : > { %774 = shalt.err (!%p771_p10)
}
  0xfe   : > { %561 = dma.vmem_to_hbm [thread:$0]  (%p925_p4), %s405_s24, 128, %s407_s22, %s392_s12  }
  0xff PF: > { %s418_s21 = sand.u32 1, %s813_s15   ;;  %p1066_p11 = scmp.ge.s32.totalorder %s825_s18, 2 }
 0x100   : > { %s419_s30 = scalar_lea.sflag [#allocation4], %s418_s21 }
 0x101   : > { %p578_p5 = pnand %p1066_p11, %p929_p6 }
 0x103   : > { %p579_p13 = pneg %p578_p5 }
 0x105   : > { %808 = dma.done.wait (%p579_p13), %s419_s30, 128  }
 0x106   : > { %810 = vsyncadd (%p579_p13), %s419_s30, 4294967168  ;;  %s1067_s11 = sld [smem:[#allocation16_spill]]  ;;  %p21_p0 = scmp.ge.s32.totalorder %s899_s8, 4  }
 0x107   : > { %s1068_s15 = smov %s817_s16  ;;  %s1069_s16 = smov %s821_s17 }
 0x108   : > { %s1071_s18 = smov %s899_s8  ;;  %23 = sbr.rel (!%p21_p0) target bundleno = 11 (0xb), region = 102 }
 0x10c   : > { %s1070_s17 = smov %s1067_s11 }
 0x10d   :  { %425 = vsyncpa [#allocation3], 1 }
 0x10e   :  { %427 = vsyncpa [#allocation3 + $0x1], 1 }
 0x10f   :  { %428 = vsyncpa [#allocation6], 1 }
 0x110   :  { %430 = vsyncpa [#allocation6 + $0x1], 1 }
 0x111   :  { %431 = vsyncpa [#allocation9], 1 }
 0x112   :  { %432 = vsyncpa [#allocation4], 1 }
 0x113   :  { %434 = vsyncpa [#allocation4 + $0x1], 1 }

</bundles_post_ra>
